<compile_context>
chip_gen: v6e
topology: v6e:2x2x1
jax: 0.10.0
libtpu: 0.0.40
codegen_flags: <defaults>
</compile_context>

<pallas_src>
import jax
import jax.numpy as jnp
from jax.experimental import pallas as pl
from jax.experimental.pallas import tpu as pltpu


def _round_up(x, m):
    return (x + m - 1) // m * m


def _conv1x1_bias_kernel(x_ref, w_ref, b_ref, o_ref):
    # x_ref: (Cin, T)        -- one batch element's pixel tile (lanes = pixels)
    # w_ref: (Cout_p, Cin)   -- VMEM-resident weight
    # b_ref: (Cout_p, 1)     -- VMEM-resident bias (broadcast over lanes)
    # o_ref: (Cout_p, T)
    y = jnp.dot(w_ref[...], x_ref[...], preferred_element_type=jnp.float32)
    o_ref[...] = (y + b_ref[...]).astype(o_ref.dtype)


def output_conv(x_nchw, weight_oihw, bias, *, tile_hw=2048):
    """1x1 Conv2d with bias: x (N,Cin,H,W), weight (Cout,Cin,1,1), bias (Cout,)."""
    N, Cin, H, W = x_nchw.shape
    Cout = weight_oihw.shape[0]
    HW = H * W
    out_dtype = x_nchw.dtype

    # ---- plain-JAX glue: reshapes + tiny pads only (no transposes) -------
    Cout_p = _round_up(Cout, 8)                       # sublane-aligned channels
    w_mat = weight_oihw.reshape(Cout, Cin)
    b_col = bias.astype(jnp.float32)
    if Cout_p != Cout:
        w_mat = jnp.pad(w_mat, ((0, Cout_p - Cout), (0, 0)))
        b_col = jnp.pad(b_col, (0, Cout_p - Cout))
    b_col = b_col.reshape(Cout_p, 1)

    x_flat = x_nchw.reshape(N, Cin, HW)               # contiguous, no copy of note

    # lane tile over H*W: multiple of 128, capped by tile_hw
    T = min(_round_up(tile_hw, 128), _round_up(HW, 128))
    HWp = _round_up(HW, T)
    if HWp != HW:
        x_flat = jnp.pad(x_flat, ((0, 0), (0, 0), (0, HWp - HW)))

    grid = (N, HWp // T)

    cost = pl.CostEstimate(
        flops=2 * N * HW * Cin * Cout,
        transcendentals=0,
        bytes_accessed=(N * Cin * HWp * x_flat.dtype.itemsize
                        + Cout_p * Cin * w_mat.dtype.itemsize
                        + Cout_p * 4
                        + N * Cout_p * HWp * jnp.dtype(out_dtype).itemsize),
    )

    out = pl.pallas_call(
        _conv1x1_bias_kernel,
        out_shape=jax.ShapeDtypeStruct((N, Cout_p, HWp), out_dtype),
        grid=grid,
        in_specs=[
            # activation tile: batch dim squeezed, Cin on sublanes, pixels on lanes
            pl.BlockSpec((None, Cin, T), lambda n, t: (n, 0, t)),
            pl.BlockSpec((Cout_p, Cin), lambda n, t: (0, 0)),   # weight: resident
            pl.BlockSpec((Cout_p, 1), lambda n, t: (0, 0)),     # bias:   resident
        ],
        out_specs=pl.BlockSpec((None, Cout_p, T), lambda n, t: (n, 0, t)),
        compiler_params=pltpu.CompilerParams(
            dimension_semantics=("parallel", "parallel"),
            vmem_limit_bytes=48 * 1024 * 1024,
        ),
        cost_estimate=cost,
    )(x_flat, w_mat, b_col)

    # slice off channel / pixel padding; reshape back to NCHW (no transpose)
    return out[:, :Cout, :HW].reshape(N, Cout, H, W)


def init_params(key, in_channel, out_channel):
    # PyTorch-like Conv2d init (kaiming-uniform-ish), weight stored in PyTorch
    # OIHW layout (Cout, Cin, 1, 1); deterministic given the key.
    kw, kb = jax.random.split(key)
    bound = (1.0 / in_channel) ** 0.5   # fan_in = Cin * 1 * 1
    w = jax.random.uniform(kw, (out_channel, in_channel, 1, 1), jnp.float32,
                           minval=-bound, maxval=bound)
    b = jax.random.uniform(kb, (out_channel,), jnp.float32,
                           minval=-bound, maxval=bound)
    return w, b


if __name__ == "__main__":
    key = jax.random.PRNGKey(0)
    kx, kp = jax.random.split(key)
    N, Cin, H, W = 2, 4, 16, 16
    Cout = 8
    x = jax.random.normal(kx, (N, Cin, H, W), jnp.float32)
    w, b = init_params(kp, Cin, Cout)

    out = jax.jit(output_conv)(x, w, b)
    out = jax.block_until_ready(out)
    assert out.shape == (N, Cout, H, W)

    # reference 1x1 conv in plain JAX (f32)
    ref = jnp.einsum("nchw,oc->nohw", x, w.reshape(Cout, Cin)) + b.reshape(1, Cout, 1, 1)
    assert bool(jnp.allclose(out, ref, atol=2e-2, rtol=1e-2))
    print("KERNEL_OK")
</pallas_src>

<mosaic_0001>
module attributes {stable_mosaic.version = 11 : i64} {
  func.func @_conv1x1_bias_kernel(%arg0: i32, %arg1: i32, %arg2: memref<1x4x256xf32, #tpu.memory_space<vmem>>, %arg3: memref<8x4xf32, #tpu.memory_space<vmem>>, %arg4: memref<8x1xf32, #tpu.memory_space<vmem>>, %arg5: memref<1x8x256xf32, #tpu.memory_space<vmem>>) attributes {dimension_semantics = [#tpu.dimension_semantics<parallel>, #tpu.dimension_semantics<parallel>], iteration_bounds = array<i64: 2, 1>, scalar_prefetch = 0 : i64, scratch_operands = 0 : i64, tpu.core_type = #tpu.core_type<tc>, window_params = [{transform_indices = @transform_0, window_bounds = array<i64: 1, 4, 256>}, {pipeline_mode = #tpu.pipeline_mode<synchronous>, transform_indices = @transform_1, window_bounds = array<i64: 8, 4>}, {pipeline_mode = #tpu.pipeline_mode<synchronous>, transform_indices = @transform_2, window_bounds = array<i64: 8, 1>}, {transform_indices = @transform_3, window_bounds = array<i64: 1, 8, 256>}]} {
    %c0 = arith.constant 0 : index
    %c0_0 = arith.constant 0 : index
    %0 = vector.load %arg3[%c0, %c0_0] : memref<8x4xf32, #tpu.memory_space<vmem>>, vector<8x4xf32>
    %c0_1 = arith.constant 0 : index
    %c0_2 = arith.constant 0 : index
    %c0_3 = arith.constant 0 : index
    %1 = vector.load %arg2[%c0_1, %c0_2, %c0_3] : memref<1x4x256xf32, #tpu.memory_space<vmem>>, vector<1x4x256xf32>
    %2 = vector.shape_cast %1 : vector<1x4x256xf32> to vector<4x256xf32>
    %cst = arith.constant dense<0.000000e+00> : vector<8x256xf32>
    %3 = tpu.matmul %0, %2, %cst {dimension_numbers = #tpu.dot_dimension_numbers<[1], [0], [0], [1], [0, 0, 1, 1], [], []>} : vector<8x4xf32>, vector<4x256xf32>, vector<8x256xf32> -> vector<8x256xf32>
    %c0_4 = arith.constant 0 : index
    %c0_5 = arith.constant 0 : index
    %4 = vector.load %arg4[%c0_4, %c0_5] : memref<8x1xf32, #tpu.memory_space<vmem>>, vector<8x1xf32>
    %5 = vector.broadcast %4 : vector<8x1xf32> to vector<8x256xf32>
    %6 = arith.addf %3, %5 : vector<8x256xf32>
    %c0_6 = arith.constant 0 : index
    %c0_7 = arith.constant 0 : index
    %c0_8 = arith.constant 0 : index
    %7 = vector.load %arg5[%c0_6, %c0_7, %c0_8] : memref<1x8x256xf32, #tpu.memory_space<vmem>>, vector<1x8x256xf32>
    %8 = vector.shape_cast %7 : vector<1x8x256xf32> to vector<8x256xf32>
    %9 = vector.shape_cast %6 : vector<8x256xf32> to vector<1x8x256xf32>
    tpu.vector_store %arg5[%c0_6, %c0_7, %c0_8], %9 {strides = array<i32>} : memref<1x8x256xf32, #tpu.memory_space<vmem>>, vector<1x8x256xf32>,
    return
  }
  func.func @transform_0(%arg0: i32, %arg1: i32) -> (i32, i32, i32) {
    %c0_i32 = arith.constant 0 : i32
    %c0_i32_0 = arith.constant 0 : i32
    return %arg0, %c0_i32, %arg1 : i32, i32, i32
  }
  func.func @transform_1(%arg0: i32, %arg1: i32) -> (i32, i32) {
    %c0_i32 = arith.constant 0 : i32
    %c0_i32_0 = arith.constant 0 : i32
    %c0_i32_1 = arith.constant 0 : i32
    return %c0_i32, %c0_i32_0 : i32, i32
  }
  func.func @transform_2(%arg0: i32, %arg1: i32) -> (i32, i32) {
    %c0_i32 = arith.constant 0 : i32
    %c0_i32_0 = arith.constant 0 : i32
    %c0_i32_1 = arith.constant 0 : i32
    return %c0_i32, %c0_i32_0 : i32, i32
  }
  func.func @transform_3(%arg0: i32, %arg1: i32) -> (i32, i32, i32) {
    %c0_i32 = arith.constant 0 : i32
    %c0_i32_0 = arith.constant 0 : i32
    return %arg0, %c0_i32, %arg1 : i32, i32, i32
  }
}

</mosaic_0001>

<bundles_post_ra>
// kernel: output_conv.1
= control target key start
LH: loop header
LB: loop body
LE: loop exit
PB: predicated region body
PF: predicated region fallthrough
CT: control target
= control target key end

     0   :  { %s479_s12 = smov 0   ;;  %s481_s13 = smov 0   ;;  %s518_s0 = inlined_call_operand.vmem [shape: f32[2,4,256], index: 0, kind: input, shape index: {}]   ;;  %s519_s1 = inlined_call_operand.vmem [shape: f32[8,4], index: 1, kind: input, shape index: {}]   ;;  %s520_s2 = inlined_call_operand.vmem [shape: f32[8,1], index: 2, kind: input, shape index: {}]   ;;  %s521_s3 = inlined_call_operand.vmem [shape: f32[2,8,256], index: 3, kind: output, shape index: {}]  }
   0x1   :  { %s483_s14 = smov 0  }
   0x2 LB: > { %s25_s15 = sadd.s32 1, %s451_s13  ;;  %p393_p0 = scmp.ge.s32.totalorder %s455_s14, 1  ;;  %s455_s14 = sphi %s483_s14, %s13_s14   ;;  %s451_s13 = sphi %s481_s13, %s523_s13   ;;  %s447_s12 = sphi %s479_s12, %s522_s12  }
   0x3   : > { %p27_p1 = scmp.ge.s32.totalorder %s25_s15, 2  ;;  %p158_p2 = scmp.lt.s32.totalorder %s455_s14, 3 }
   0x5   : > { %s525_s15 = smov (%p27_p1, %s25_s15), 0  ;;  %p159_p3 = pnand %p393_p0, %p158_p2 }
   0x6   : > { %p191_p4 = scmp.lt.s32.totalorder (!%p159_p3), %s447_s12, 1 }
   0x7   : > { %162 = sbr.rel (%p159_p3) target bundleno = 218 (0xda), region = 32 }
   0xc   : > { %v457_v0 = vmov 0.0   ;;  %v458_v1 = vmov 0   ;;  %v212_v2 = vld [vmem:[%s520_s2] sm:$0xff]  ;;  %s527_s12 = smov (!%p191_p4, %s447_s12), 1  ;;  %vm224_vm0 = vcmask 1043456   ;;  %vm220_vm1 = vcmask 31744  }
   0xd   : > { %293 = vmatprep.mubr.f32.mxu0 %v457_v0  ;;  %431 = vset.pattern.permute.xlu0 %v458_v1  ;;  %s403_s18 = sshll.u32 %s527_s12, 3  ;;  %v210_v5 = vld [vmem:[%s519_s1] sm:$0xff]  ;;  %s404_s24 = sshll.u32 %s527_s12, 4 }
   0xe   : > { %215 = vperm.xlu0 %431, %v212_v2   ;;  %s198_s21 = scalar_lea.vmem %s518_s0, %s403_s18  ;;  %s208_s27 = scalar_lea.vmem %s521_s3, %s404_s24 }
   0xf   : > { %v211_v3 = vld [vmem:[%s198_s21] sm:$0xff] }
  0x10   : > { %v219_v4 = vcombine.high %v211_v3, %v211_v3 }
  0x12   : > { %398 = vmatprep.subr.msk.mxu0 %vm224_vm0, %v219_v4 }
  0x13   : > { %399 = vmatpush1.msk.msra.mxu0 %vm224_vm0, %v211_v3 }
  0x14   : > { %400 = vmatmul.mubr.msk.f32.vlgmr.msra.gmra.mxu0 %vm220_vm1, %v210_v5 }
  0x89   : > { %v216_v6 = vpop.permute.xlu0 %215 }
  0xd4   : > { %v295_v7 = vpop.f32.mrf.mxu0 }
  0xd5   : > { %v296_v8 = vadd.f32 %v295_v7, %v216_v6 }
  0xd6   : > { %v297_v9 = vpop.f32.mrf.mxu0 }
  0xd7   : > { %300 = vst [vmem:[%s208_s27] sm:$0xff] %v296_v8  ;;  %v298_v10 = vadd.f32 %v297_v9, %v216_v6 }
  0xd9   : > { %301 = vst [vmem:[%s208_s27 + $0x8] sm:$0xff] %v298_v10 }
  0xda PF: > { %s13_s14 = sadd.s32 1, %s455_s14   ;;  %s522_s12 = smov %s451_s13 }
  0xdb   : > { %p10_p5 = scmp.ge.s32.totalorder %s13_s14, 4   ;;  %s523_s13 = smov %s525_s15 }
  0xdd   :  { %12 = sbr.rel (!%p10_p5) target bundleno = 2 (0x2), region = 62 }

</bundles_post_ra>
